<compile_context>
chip_gen: v6e
topology: v6e:2x2x1
jax: 0.10.0
libtpu: 0.0.40
codegen_flags: <defaults>
</compile_context>

<pallas_src>
import functools

import jax
import jax.numpy as jnp
from jax.experimental import pallas as pl
from jax.experimental.pallas import tpu as pltpu


def _round_up(a, m):
    return (a + m - 1) // m * m


_VMEM_FALLBACK_BYTES = 64 * 1024 * 1024  # conservative (v7x physical VMEM)


@functools.lru_cache(maxsize=None)
def _vmem_limit_bytes():
    """Scoped-VMEM limit: ~80% of physical VMEM of the current generation."""
    try:
        info = pltpu.get_tpu_info()
        cap = int(getattr(info, "vmem_capacity_bytes", _VMEM_FALLBACK_BYTES))
    except Exception:  # no TPU info available -> stay conservative
        cap = _VMEM_FALLBACK_BYTES
    return int(cap * 0.8)


def _select_tiles(M, Hp, itemsize, vmem_limit):
    """Pick (tm, tn, tk, full_k) sized against the per-generation VMEM budget.

    Priorities: largest tm first (weight HBM traffic scales as Mp/tm), then
    largest tn (lane-dense output stores, fewer grid steps).  Full-K is
    preferred: it removes the reduction carry and per-k step overhead.
    """
    budget = int(vmem_limit * 0.75)          # headroom for pipeline/internal scratch
    m_cap = _round_up(M, 8)
    tn_cands = [c for c in (1024, 512, 256, 128) if Hp % c == 0] or [Hp]
    tm_cands = (1024, 512, 256, 128, 64, 32, 16, 8)

    # --- full-K: one contraction per output tile (double-buffered inputs/out
    #     plus an f32 result buffer for the MXU output). ---
    for tm in tm_cands:
        tm_eff = min(tm, m_cap)
        for tn in tn_cands:
            use = (2 * (tm_eff * Hp + Hp * tn + tn + tm_eff * tn) * itemsize
                   + tm_eff * tn * 4)
            if use <= budget:
                return tm_eff, tn, Hp, True

    # --- K-tiled fallback (tk == tn so the residual folds into the x tile). ---
    for tm in tm_cands:
        tm_eff = min(tm, m_cap)
        for tn in tn_cands:
            tk = tn
            use = (2 * (tm_eff * tk + tk * tn + tn + tm_eff * tn) * itemsize
                   + tm_eff * tn * 4)
            if use <= budget:
                return tm_eff, tn, tk, False

    return min(8, m_cap), 128, 128, False    # last resort (tiny tiles)


def _residual_fullk_kernel(x_ref, w_ref, b_ref, o_ref, *, tn):
    # x_ref: [tm, Hp]   (resident across the j sweep)
    # w_ref: [Hp, tn]   W^T column block j
    # b_ref: [1,  tn]
    # o_ref: [tm, tn]
    j = pl.program_id(1)
    acc = jnp.dot(x_ref[...], w_ref[...], preferred_element_type=jnp.float32)
    # Residual tile (i, j) is a lane-aligned column slice of the x tile
    # (square Linear: H_in == H_out), so no extra HBM read of x is needed.
    col = pl.multiple_of(j * tn, tn)
    res = x_ref[:, pl.ds(col, tn)]
    o_ref[...] = (acc
                  + b_ref[...].astype(jnp.float32)
                  + res.astype(jnp.float32)).astype(o_ref.dtype)


def _residual_ktiled_kernel(x_ref, w_ref, b_ref, o_ref, acc_ref):
    # x_ref: [tm, tk]   (tk == tn)
    # w_ref: [tk, tn]
    # b_ref: [1,  tn]
    # o_ref: [tm, tn]
    # acc_ref: [tm, tn] f32 scratch, persists across k
    j = pl.program_id(1)
    k = pl.program_id(2)

    @pl.when(k == 0)
    def _():
        acc_ref[...] = jnp.zeros_like(acc_ref)

    acc_ref[...] += jnp.dot(x_ref[...], w_ref[...],
                            preferred_element_type=jnp.float32)

    # With tk == tn, the x matmul tile at grid step k == j is exactly the
    # residual tile (i, j): add it once, no separate residual input.
    @pl.when(k == j)
    def _():
        acc_ref[...] += x_ref[...].astype(jnp.float32)

    @pl.when(k == pl.num_programs(2) - 1)
    def _():
        o_ref[...] = (acc_ref[...]
                      + b_ref[...].astype(jnp.float32)).astype(o_ref.dtype)


@jax.jit
def residual_dense(x, w_t, b):
    """Residual(Linear)(x) = x @ W^T + b + x.

    x:   [B, S, H]
    w_t: [H, H]   (already transposed: W^T, i.e. [H_in, H_out])
    b:   [H]
    """
    B, S, H = x.shape
    h_in, h_out = w_t.shape
    assert h_in == H and h_out == H, (
        "Residual requires a square Linear (H_in == H_out == H)")
    M = B * S
    dtype = x.dtype
    itemsize = jnp.dtype(dtype).itemsize

    Hp = _round_up(H, 128)
    vmem_limit = _vmem_limit_bytes()
    tm, tn, tk, full_k = _select_tiles(M, Hp, itemsize, vmem_limit)
    Mp = _round_up(M, tm)

    # ---- padding (only when needed; zero pad rows of W / entries of b so the
    #      padded-K contribution is exactly zero) ----
    x2 = x.reshape(M, H)
    if Mp != M or Hp != H:
        x2 = jnp.pad(x2, ((0, Mp - M), (0, Hp - H)))
    if Hp != H:
        w2 = jnp.pad(w_t, ((0, Hp - H), (0, Hp - H)))
        b2 = jnp.pad(b.reshape(1, H), ((0, 0), (0, Hp - H)))
    else:
        w2 = w_t
        b2 = b.reshape(1, H)

    n_i = Mp // tm
    n_j = Hp // tn

    if full_k:
        grid = (n_i, n_j)
        in_specs = [
            pl.BlockSpec((tm, Hp), lambda i, j: (i, 0)),   # x (matmul + residual)
            pl.BlockSpec((Hp, tn), lambda i, j: (0, j)),   # W^T column block
            pl.BlockSpec((1, tn), lambda i, j: (0, j)),    # bias
        ]
        out_specs = pl.BlockSpec((tm, tn), lambda i, j: (i, j))
        scratch_shapes = []
        kernel = functools.partial(_residual_fullk_kernel, tn=tn)
        dim_sem = ("parallel", "parallel")
        x_bytes = Mp * Hp * itemsize                       # x resident across j
    else:
        grid = (n_i, n_j, Hp // tk)
        in_specs = [
            pl.BlockSpec((tm, tk), lambda i, j, k: (i, k)),  # x
            pl.BlockSpec((tk, tn), lambda i, j, k: (k, j)),  # W^T tile
            pl.BlockSpec((1, tn), lambda i, j, k: (0, j)),   # bias
        ]
        out_specs = pl.BlockSpec((tm, tn), lambda i, j, k: (i, j))
        scratch_shapes = [pltpu.VMEM((tm, tn), jnp.float32)]
        kernel = _residual_ktiled_kernel
        dim_sem = ("parallel", "parallel", "arbitrary")
        x_bytes = n_j * Mp * Hp * itemsize                 # x re-read per j sweep

    cost = pl.CostEstimate(
        flops=2 * Mp * Hp * Hp + 2 * Mp * Hp,
        transcendentals=0,
        bytes_accessed=(x_bytes
                        + n_i * Hp * Hp * itemsize         # W re-read per M block
                        + n_i * Hp * itemsize              # bias
                        + Mp * Hp * itemsize),             # output write
    )

    out = pl.pallas_call(
        kernel,
        out_shape=jax.ShapeDtypeStruct((Mp, Hp), dtype),
        grid_spec=pltpu.PrefetchScalarGridSpec(
            num_scalar_prefetch=0,
            grid=grid,
            in_specs=in_specs,
            out_specs=out_specs,
            scratch_shapes=scratch_shapes,
        ),
        compiler_params=pltpu.CompilerParams(
            dimension_semantics=dim_sem,
            vmem_limit_bytes=vmem_limit,
        ),
        cost_estimate=cost,
    )(x2, w2, b2)

    return out[:M, :H].reshape(B, S, H)


if __name__ == "__main__":
    B, S, H = 2, 8, 32
    key = jax.random.PRNGKey(0)
    kx, kw, kb = jax.random.split(key, 3)

    x = jax.random.normal(kx, (B, S, H), dtype=jnp.float32)
    # Deterministic parameter init (mimics nn.Linear uniform init scale).
    bound = 1.0 / jnp.sqrt(H)
    w = jax.random.uniform(kw, (H, H), minval=-bound, maxval=bound,
                           dtype=jnp.float32)       # [out, in] like torch
    b = jax.random.uniform(kb, (H,), minval=-bound, maxval=bound,
                           dtype=jnp.float32)

    out = residual_dense(x, w.T, b)
    out = jax.block_until_ready(out)

    # Pure-JAX reference: func(x) + x
    ref = jnp.einsum("bsh,oh->bso", x, w) + b + x
    assert out.shape == (B, S, H)
    assert jnp.allclose(out, ref, atol=1e-5, rtol=1e-5)

    print("KERNEL_OK")
</pallas_src>

<mosaic_0001>
module attributes {stable_mosaic.version = 11 : i64} {
  func.func @_residual_fullk_kernel(%arg0: i32, %arg1: i32, %arg2: memref<16x128xf32, #tpu.memory_space<vmem>>, %arg3: memref<128x128xf32, #tpu.memory_space<vmem>>, %arg4: memref<1x128xf32, #tpu.memory_space<vmem>>, %arg5: memref<16x128xf32, #tpu.memory_space<vmem>>) attributes {dimension_semantics = [#tpu.dimension_semantics<parallel>, #tpu.dimension_semantics<parallel>], iteration_bounds = array<i64: 1, 1>, scalar_prefetch = 0 : i64, scratch_operands = 0 : i64, tpu.core_type = #tpu.core_type<tc>, window_params = [{transform_indices = @transform_0, window_bounds = array<i64: 16, 128>}, {transform_indices = @transform_1, window_bounds = array<i64: 128, 128>}, {transform_indices = @transform_2, window_bounds = array<i64: 1, 128>}, {transform_indices = @transform_3, window_bounds = array<i64: 16, 128>}]} {
    %c0 = arith.constant 0 : index
    %c0_0 = arith.constant 0 : index
    %0 = vector.load %arg2[%c0, %c0_0] : memref<16x128xf32, #tpu.memory_space<vmem>>, vector<16x128xf32>
    %c0_1 = arith.constant 0 : index
    %c0_2 = arith.constant 0 : index
    %1 = vector.load %arg3[%c0_1, %c0_2] : memref<128x128xf32, #tpu.memory_space<vmem>>, vector<128x128xf32>
    %cst = arith.constant dense<0.000000e+00> : vector<16x128xf32>
    %2 = tpu.matmul %0, %1, %cst {dimension_numbers = #tpu.dot_dimension_numbers<[1], [0], [0], [1], [0, 0, 1, 1], [], []>} : vector<16x128xf32>, vector<128x128xf32>, vector<16x128xf32> -> vector<16x128xf32>
    %c128_i32 = arith.constant 128 : i32
    %3 = arith.muli %arg1, %c128_i32 : i32
    %4 = tpu.assume_multiple %3, 128 : i32
    %c0_3 = arith.constant 0 : index
    %5 = arith.index_cast %4 : i32 to index
    %6 = vector.load %arg2[%c0_3, %5] : memref<16x128xf32, #tpu.memory_space<vmem>>, vector<16x128xf32>
    %c0_4 = arith.constant 0 : index
    %c0_5 = arith.constant 0 : index
    %7 = vector.load %arg4[%c0_4, %c0_5] : memref<1x128xf32, #tpu.memory_space<vmem>>, vector<1x128xf32>
    %8 = vector.broadcast %7 : vector<1x128xf32> to vector<16x128xf32>
    %9 = arith.addf %2, %8 : vector<16x128xf32>
    %10 = arith.addf %9, %6 : vector<16x128xf32>
    %c0_6 = arith.constant 0 : index
    %c0_7 = arith.constant 0 : index
    %11 = vector.load %arg5[%c0_6, %c0_7] : memref<16x128xf32, #tpu.memory_space<vmem>>, vector<16x128xf32>
    tpu.vector_store %arg5[%c0_6, %c0_7], %10 {strides = array<i32>} : memref<16x128xf32, #tpu.memory_space<vmem>>, vector<16x128xf32>,
    return
  }
  func.func @transform_0(%arg0: i32, %arg1: i32) -> (i32, i32) {
    %c0_i32 = arith.constant 0 : i32
    %c0_i32_0 = arith.constant 0 : i32
    return %arg0, %c0_i32 : i32, i32
  }
  func.func @transform_1(%arg0: i32, %arg1: i32) -> (i32, i32) {
    %c0_i32 = arith.constant 0 : i32
    %c0_i32_0 = arith.constant 0 : i32
    return %c0_i32, %arg1 : i32, i32
  }
  func.func @transform_2(%arg0: i32, %arg1: i32) -> (i32, i32) {
    %c0_i32 = arith.constant 0 : i32
    %c0_i32_0 = arith.constant 0 : i32
    return %c0_i32, %arg1 : i32, i32
  }
  func.func @transform_3(%arg0: i32, %arg1: i32) -> (i32, i32) {
    %c0_i32 = arith.constant 0 : i32
    return %arg0, %arg1 : i32, i32
  }
}

</mosaic_0001>

<bundles_post_ra>
// kernel: residual_dense.1
= control target key start
LH: loop header
LB: loop body
LE: loop exit
PB: predicated region body
PF: predicated region fallthrough
CT: control target
= control target key end

     0   :  { %s266_s1 = inlined_call_operand.vmem [shape: f32[128,128], index: 1, kind: input, shape index: {}]   ;;  %s267_s0 = inlined_call_operand.vmem [shape: f32[16,128], index: 0, kind: input, shape index: {}]   ;;  %s268_s2 = inlined_call_operand.vmem [shape: f32[1,128], index: 2, kind: input, shape index: {}]   ;;  %s269_s3 = inlined_call_operand.vmem [shape: f32[16,128], index: 3, kind: output, shape index: {}]  }
   0x1   :  { %v31_v0 = vld [vmem:[%s266_s1 + $0x78] sm:$0xff]  ;;  %v30_v1 = vld [vmem:[%s266_s1 + $0x70] sm:$0xff]  ;;  %v29_v2 = vld [vmem:[%s266_s1 + $0x68] sm:$0xff] }
   0x2   :  { %148 = vmatprep.subr.mxu0 %v31_v0  ;;  %v28_v3 = vld [vmem:[%s266_s1 + $0x60] sm:$0xff]  ;;  %v27_v5 = vld [vmem:[%s266_s1 + $0x58] sm:$0xff]  ;;  %v26_v6 = vld [vmem:[%s266_s1 + $0x50] sm:$0xff] }
   0x3   :  { %149 = vmatpush3.msra.mxu0 %v31_v0  ;;  %v14_v4 = vld [vmem:[%s267_s0] sm:$0xff]  ;;  %v25_v7 = vld [vmem:[%s266_s1 + $0x48] sm:$0xff]  ;;  %v23_v9 = vld [vmem:[%s266_s1 + $0x38] sm:$0xff] }
   0x4   :  { %150 = vmatprep.subr.mxu0 %v30_v1  ;;  %180 = vmatprep.mubr.f32.mxu0 %v14_v4  ;;  %v24_v8 = vld [vmem:[%s266_s1 + $0x40] sm:$0xff]  ;;  %v22_v10 = vld [vmem:[%s266_s1 + $0x30] sm:$0xff]  ;;  %v21_v11 = vld [vmem:[%s266_s1 + $0x28] sm:$0xff] }
   0x5   :  { %151 = vmatpush3.msra.mxu0 %v30_v1  ;;  %v20_v12 = vld [vmem:[%s266_s1 + $0x20] sm:$0xff]  ;;  %v19_v13 = vld [vmem:[%s266_s1 + $0x18] sm:$0xff]  ;;  %v18_v14 = vld [vmem:[%s266_s1 + $0x10] sm:$0xff] }
   0x6   :  { %152 = vmatprep.subr.mxu0 %v29_v2  ;;  %v17_v15 = vld [vmem:[%s266_s1 + $0x8] sm:$0xff]  ;;  %v16_v16 = vld [vmem:[%s266_s1] sm:$0xff] }
   0x7   :  { %153 = vmatpush3.msra.mxu0 %v29_v2  ;;  %v15_v17 = vld [vmem:[%s267_s0 + $0x8] sm:$0xff]  ;;  %v129_v18 = vld [vmem:[%s268_s2] ss:$0 sm:$0xff] }
   0x8   :  { %154 = vmatprep.subr.mxu0 %v28_v3 }
   0x9   :  { %155 = vmatpush3.msra.mxu0 %v28_v3 }
   0xa   :  { %156 = vmatprep.subr.mxu0 %v27_v5 }
   0xb   :  { %157 = vmatpush3.msra.mxu0 %v27_v5 }
   0xc   :  { %158 = vmatprep.subr.mxu0 %v26_v6 }
   0xd   :  { %159 = vmatpush3.msra.mxu0 %v26_v6 }
   0xe   :  { %160 = vmatprep.subr.mxu0 %v25_v7 }
   0xf   :  { %161 = vmatpush3.msra.mxu0 %v25_v7 }
  0x10   :  { %162 = vmatprep.subr.mxu0 %v24_v8 }
  0x11   :  { %163 = vmatpush3.msra.mxu0 %v24_v8 }
  0x12   :  { %164 = vmatprep.subr.mxu0 %v23_v9 }
  0x13   :  { %165 = vmatpush3.msra.mxu0 %v23_v9 }
  0x14   :  { %166 = vmatprep.subr.mxu0 %v22_v10 }
  0x15   :  { %167 = vmatpush3.msra.mxu0 %v22_v10 }
  0x16   :  { %168 = vmatprep.subr.mxu0 %v21_v11 }
  0x17   :  { %169 = vmatpush3.msra.mxu0 %v21_v11 }
  0x18   :  { %170 = vmatprep.subr.mxu0 %v20_v12 }
  0x19   :  { %171 = vmatpush3.msra.mxu0 %v20_v12 }
  0x1a   :  { %172 = vmatprep.subr.mxu0 %v19_v13 }
  0x1b   :  { %173 = vmatpush3.msra.mxu0 %v19_v13 }
  0x1c   :  { %174 = vmatprep.subr.mxu0 %v18_v14 }
  0x1d   :  { %175 = vmatpush3.msra.mxu0 %v18_v14 }
  0x1e   :  { %176 = vmatprep.subr.mxu0 %v17_v15 }
  0x1f   :  { %177 = vmatpush3.msra.mxu0 %v17_v15 }
  0x20   :  { %178 = vmatprep.subr.mxu0 %v16_v16 }
  0x21   :  { %179 = vmatpush3.msra.mxu0 %v16_v16 }
  0x22   :  { %181 = vmatmul.mubr.f32.vlgmr.msra.gmra.mxu0 %v15_v17 }
  0xe2   :  { %v182_v19 = vpop.f32.mrf.mxu0 }
  0xe3   :  { %v117_v20 = vadd.f32 %v182_v19, %v129_v18 }
  0xe4   :  { %v111_v21 = vpop.f32.mrf.mxu0 }
  0xe5   :  { %v121_v22 = vadd.f32 %v117_v20, %v15_v17  ;;  %v112_v23 = vadd.f32 %v129_v18, %v111_v21 }
  0xe7   :  { %123 = vst [vmem:[%s269_s3 + $0x8] sm:$0xff] %v121_v22  ;;  %v120_v24 = vadd.f32 %v112_v23, %v14_v4 }
  0xe9   :  { %122 = vst [vmem:[%s269_s3] sm:$0xff] %v120_v24 }

</bundles_post_ra>
